<compile_context>
chip_gen: v7x
topology: tpu7x:2x2x1
jax: 0.10.0
libtpu: 0.0.40
codegen_flags: <defaults>
</compile_context>

<pallas_src>
import jax
import jax.numpy as jnp
from jax.experimental import pallas as pl
from jax.experimental.pallas import tpu as pltpu  # noqa: F401  (TPU backend import)


_LANES = 128  # full lane width -> single unmasked vld/vst


def _copy_kernel(x_ref, o_ref):
    # x_ref / o_ref: lane-dense (1, 128) slab resident in VMEM.
    # Single unmasked vld/vst pair — no arithmetic, no control flow.
    o_ref[...] = x_ref[...]


def net_reshape_forward(x):
    """Equivalent of torch.reshape(input, (2, 9)); materialization via Pallas."""
    assert x.size == 18, "torch.reshape(input, (2, 9)) requires 18 elements"

    # Wrapper glue (metadata / cheap fused ops under jit): row-major reflow,
    # then pad to a full 128-lane slab so the kernel store is unmasked.
    flat = jnp.reshape(x, (1, 18))
    slab = jnp.pad(flat, ((0, 0), (0, _LANES - 18)))

    out_slab = pl.pallas_call(
        _copy_kernel,
        out_shape=jax.ShapeDtypeStruct((1, _LANES), x.dtype),
        # Single grid point; block == full array extent and the last dim is a
        # full 128-lane row.  NOTE: this shape is special-cased to the fixed
        # 18-element op — generalizing to larger inputs must respect the
        # (8, 128) tiling rules and re-introduce a grid.
        in_specs=[pl.BlockSpec((1, _LANES), lambda: (0, 0))],
        out_specs=pl.BlockSpec((1, _LANES), lambda: (0, 0)),
        # No input_output_aliases: without jit donation XLA would copy to
        # preserve the caller's buffer anyway, so the plain copy is honest.
    )(slab)

    # Wrapper glue: drop the pad lanes, restore the target (2, 9) shape
    # (metadata-only).
    return jnp.reshape(out_slab[0, :18], (2, 9))


# jit the whole forward so the pad / slice / reshape glue fuses around the
# single custom call instead of materializing extra HBM round-trips.
net_reshape_forward_jit = jax.jit(net_reshape_forward)


if __name__ == "__main__":
    key = jax.random.PRNGKey(0)
    # Any 18-element input works; (3, 6) exercises a non-trivial row-major reflow.
    x = jax.random.normal(key, (3, 6), dtype=jnp.float32)

    y = net_reshape_forward_jit(x)
    jax.block_until_ready(y)

    # Correctness check against the pure-JAX reference of torch.reshape.
    ref = jnp.reshape(x, (2, 9))
    assert y.shape == (2, 9) and y.dtype == x.dtype
    assert jnp.array_equal(y, ref), "Pallas reshape result mismatch"

    print("KERNEL_OK")
</pallas_src>

<mosaic_0001>
module attributes {stable_mosaic.version = 11 : i64} {
  func.func @_copy_kernel(%arg0: memref<1x128xf32, #tpu.memory_space<vmem>>, %arg1: memref<1x128xf32, #tpu.memory_space<vmem>>) attributes {dimension_semantics = [], scalar_prefetch = 0 : i64, scratch_operands = 0 : i64, tpu.core_type = #tpu.core_type<tc>} {
    %c0 = arith.constant 0 : index
    %c0_0 = arith.constant 0 : index
    %0 = vector.load %arg0[%c0, %c0_0] : memref<1x128xf32, #tpu.memory_space<vmem>>, vector<1x128xf32>
    %c0_1 = arith.constant 0 : index
    %c0_2 = arith.constant 0 : index
    %1 = vector.load %arg1[%c0_1, %c0_2] : memref<1x128xf32, #tpu.memory_space<vmem>>, vector<1x128xf32>
    tpu.vector_store %arg1[%c0_1, %c0_2], %0 {strides = array<i32>} : memref<1x128xf32, #tpu.memory_space<vmem>>, vector<1x128xf32>,
    return
  }
}

</mosaic_0001>

<bundles_post_ra>
// kernel: squeeze.1
= control target key start
LH: loop header
LB: loop body
LE: loop exit
PB: predicated region body
PF: predicated region fallthrough
CT: control target
= control target key end

     0   :  { %s85_s0 = inlined_call_operand.vmem [shape: f32[18], index: 0, kind: input, shape index: {}]   ;;  %s86_s1 = inlined_call_operand.hbm [shape: f32[2,9], index: 1, kind: output, shape index: {}]  }
   0x1   :  { %v5_v0 = vld [vmem:[%s85_s0] sm:$0x1] }
   0x2   :  { %2 = vsyncpa [#allocation1], 0  ;;  %6 = vst [vmem:[#allocation3] sm:$0x1] %v5_v0  ;;  %vm8_vm0 = vcmask 72704   ;;  %s58_s0 = smov 119  }
   0x3   :  { %s59_s8 = smov [#allocation0]  }
   0x4   :  { %s26_s9 = sshll.u32 %s59_s8, 4  ;;  %s27_s9 = int_to_ptr.vmem [resolvable:$true] %s26_s9 }
   0x5   :  { %s34_s10 = scalar_lea.vmem %s27_s9, 32  ;;  %p39_p1 = scmp.lt.s32.totalorder %s27_s9, %s27_s9 }
   0x6   :  { %p35_p0 = scmp.ne.s32.totalorder %s27_s9, %s34_s10  ;;  %p40_p2 = scmp.lt.s32.totalorder %s34_s10, %s34_s10 }
   0x8   :  { %p41_p3 = por %p40_p2, %p39_p1 }
   0x9   :  { %v10_v1 = vld [vmem:[#allocation3] sm:$0x1]  }
   0xa   :  { %v7_v2 = vld [vmem:[#allocation3] sm:$0x1]   ;;  %11 = vrot.lane.b32.xlu0 %v10_v1, %s58_s0  ;;  %p42_p4 = pnand %p41_p3, %p35_p0 }
   0xb   :  { %9 = vst.msk [vmem:[#allocation2] sm:$0x1] %vm8_vm0, %v7_v2  }
  0x7c   :  { %v12_v3 = vpop.permute.xlu0 %11  }
  0x7d   :  { %15 = vst.msk [vmem:[#allocation2 + $0x1] sm:$0x1] %vm8_vm0, %v12_v3  }
  0x84   :  { %v19_v4 = vld [vmem:[#allocation2] sm:$0x3] }
  0x85   :  { %21 = vst [vmem:[#allocation0] sm:$0x3] %v19_v4 }
  0x86   :  { %45 = shalt.err (!%p42_p4)
}
  0x87   :  { %s46_s13 = scalar_lea.hbm %s86_s1, 32 }
  0x88   :  { %p47_p5 = scmp.ne.s32.totalorder %s86_s1, %s46_s13  ;;  %p50_p6 = scmp.lt.u32.totalorder %s46_s13, %s86_s1 }
  0x8a   :  { %p52_p7 = pnand %p50_p6, %p47_p5 }
  0x8c   :  { %55 = shalt.err (!%p52_p7)
}
  0x8d   :  { %29 = dma.vmem_to_hbm [thread:$0]  %s27_s9, 32, %s86_s1, [#allocation1]  }
  0x8e   :  { %56 = dma.done.wait [#allocation1], 32  }
  0x8f   :  { %57 = vsyncadd [#allocation1], 4294967264 }
  0x90   :  { %31 = vsyncpa [#allocation1], 1 }

// kernel: net_reshape_forward.1
= control target key start
LH: loop header
LB: loop body
LE: loop exit
PB: predicated region body
PF: predicated region fallthrough
CT: control target
= control target key end

     0   :  { %s30_s0 = inlined_call_operand.vmem [shape: f32[1,128], index: 0, kind: input, shape index: {}]   ;;  %s31_s1 = inlined_call_operand.vmem [shape: f32[1,128], index: 1, kind: output, shape index: {}]  }
   0x1   :  { %v8_v0 = vld [vmem:[%s30_s0] sm:$0x1] }
   0x2   :  { %9 = vst [vmem:[%s31_s1] sm:$0x1] %v8_v0 }

</bundles_post_ra>
